<compile_context>
chip_gen: v6e
topology: v6e:2x2x1
jax: 0.10.0
libtpu: 0.0.40
codegen_flags: <defaults>
</compile_context>

<pallas_src>
import jax
import jax.numpy as jnp
from jax.experimental import pallas as pl
from jax.experimental.pallas import tpu as pltpu


# ---------------------------------------------------------------------------
# Kernel
# ---------------------------------------------------------------------------
def _critic_kernel(s_ref, a_ref,
                   w1s_ref, w1a_ref, b1_ref,
                   w2_ref, b2_ref,
                   wq_ref, bq_ref,
                   q_ref):
    """Fused twin-head critic. Output (TILE_B, 2): q1 in lane 0, q2 in lane 1."""
    cdt = w1s_ref.dtype                       # MXU compute dtype (bf16 by default)
    s = s_ref[...].astype(cdt)                # (TB, input_dim)
    a = a_ref[...].astype(cdt)                # (TB, n_actions)

    # Layer 1, both heads at once: relu(s @ W1s + a @ W1a + b1) -> (TB, 2*fc1)
    h1 = jnp.dot(s, w1s_ref[...], preferred_element_type=jnp.float32)
    h1 = h1 + jnp.dot(a, w1a_ref[...], preferred_element_type=jnp.float32)
    h1 = jnp.maximum(h1 + b1_ref[...], 0.0)

    # Layer 2 (block-diagonal weights keep the heads independent) -> (TB, 2*fc2)
    h2 = jnp.maximum(
        jnp.dot(h1.astype(cdt), w2_ref[...], preferred_element_type=jnp.float32)
        + b2_ref[...],
        0.0)

    # Output layer (block-diagonal) -> (TB, 2)
    q = jnp.dot(h2.astype(cdt), wq_ref[...], preferred_element_type=jnp.float32)
    q_ref[...] = (q + bq_ref[...]).astype(q_ref.dtype)


# ---------------------------------------------------------------------------
# Wrapper
# ---------------------------------------------------------------------------
def critic_forward(state, action, packed_params, *, tile_b_max=512):
    """Pallas implementation of CriticNetwork.forward(state, action) -> (q1, q2)."""
    w1s, w1a, b1, w2, b2, wq, bq = packed_params
    B, input_dim = state.shape
    n_actions = action.shape[1]

    state = state.astype(jnp.float32)
    action = action.astype(jnp.float32)

    # Sublane-aligned batch tile; pad the batch axis (cheap) if it doesn't divide.
    tile_b = min(max(B, 8), tile_b_max)
    tile_b = ((tile_b + 7) // 8) * 8
    padded_b = pl.cdiv(B, tile_b) * tile_b
    if padded_b != B:
        pad = padded_b - B
        state = jnp.pad(state, ((0, pad), (0, 0)))
        action = jnp.pad(action, ((0, pad), (0, 0)))

    def resident(arr):
        # Full-array block, same block index for every grid step -> weights stay
        # resident in VMEM across all batch tiles.
        return pl.BlockSpec(arr.shape, lambda i: (0, 0))

    q = pl.pallas_call(
        _critic_kernel,
        out_shape=jax.ShapeDtypeStruct((padded_b, 2), jnp.float32),
        grid=(padded_b // tile_b,),
        in_specs=[
            pl.BlockSpec((tile_b, input_dim), lambda i: (i, 0)),   # state tile
            pl.BlockSpec((tile_b, n_actions), lambda i: (i, 0)),   # action tile
            resident(w1s), resident(w1a), resident(b1),
            resident(w2), resident(b2),
            resident(wq), resident(bq),
        ],
        out_specs=pl.BlockSpec((tile_b, 2), lambda i: (i, 0)),     # lane-dense (B, 2)
        compiler_params=pltpu.CompilerParams(
            dimension_semantics=("parallel",)),                    # megacore / v7x 2-TC
    )(state, action, w1s, w1a, b1, w2, b2, wq, bq)

    q = q[:B]
    return q[:, 0:1], q[:, 1:2]


# ---------------------------------------------------------------------------
# Parameter init (PyTorch nn.Linear default init) and fused packing
# ---------------------------------------------------------------------------
def init_params(key, input_dim, n_actions, fc1_dims, fc2_dims):
    """Per-head f32 params, stored transposed as (in_features, out_features)."""
    def linear(key, fan_in, fan_out):
        kw, kb = jax.random.split(key)
        bound = 1.0 / jnp.sqrt(float(fan_in))
        w = jax.random.uniform(kw, (fan_in, fan_out), jnp.float32, -bound, bound)
        b = jax.random.uniform(kb, (1, fan_out), jnp.float32, -bound, bound)
        return w, b

    in_cat = input_dim + n_actions
    keys = jax.random.split(key, 6)
    w1, b1 = linear(keys[0], in_cat, fc1_dims)
    w2, b2 = linear(keys[1], fc1_dims, fc2_dims)
    wq1, bq1 = linear(keys[2], fc2_dims, 1)
    w3, b3 = linear(keys[3], in_cat, fc1_dims)
    w4, b4 = linear(keys[4], fc1_dims, fc2_dims)
    wq2, bq2 = linear(keys[5], fc2_dims, 1)
    return (w1, b1, w2, b2, wq1, bq1, w3, b3, w4, b4, wq2, bq2)


def pack_params(params, input_dim, compute_dtype=jnp.bfloat16):
    """Fuse the twin heads into one weight set consumed by the kernel.

    Layer 1: [w1 | w3] -> (in_cat, 2*fc1), split into state rows / action rows.
    Layer 2: block-diag([w2, w4]) -> (2*fc1, 2*fc2).
    Output : block-diag([wq1, wq2]) -> (2*fc2, 2).
    Weights are cast to `compute_dtype` (bf16) for the MXU; biases stay f32.
    """
    (w1, b1, w2, b2, wq1, bq1, w3, b3, w4, b4, wq2, bq2) = params
    fc1 = w1.shape[1]
    fc2 = w2.shape[1]

    w_l1 = jnp.concatenate([w1, w3], axis=1)            # (in_cat, 2*fc1)
    w1s = w_l1[:input_dim]                               # (input_dim, 2*fc1)
    w1a = w_l1[input_dim:]                               # (n_actions, 2*fc1)
    b1f = jnp.concatenate([b1, b3], axis=1)              # (1, 2*fc1)

    z2 = jnp.zeros((fc1, fc2), w2.dtype)
    w2f = jnp.block([[w2, z2], [z2, w4]])                # (2*fc1, 2*fc2)
    b2f = jnp.concatenate([b2, b4], axis=1)              # (1, 2*fc2)

    zq = jnp.zeros((fc2, 1), wq1.dtype)
    wqf = jnp.block([[wq1, zq], [zq, wq2]])              # (2*fc2, 2)
    bqf = jnp.concatenate([bq1, bq2], axis=1)            # (1, 2)

    cast = lambda w: w.astype(compute_dtype)
    return (cast(w1s), cast(w1a), b1f.astype(jnp.float32),
            cast(w2f), b2f.astype(jnp.float32),
            cast(wqf), bqf.astype(jnp.float32))


# ---------------------------------------------------------------------------
# Pure-JAX reference of the original PyTorch forward (f32 end-to-end)
# ---------------------------------------------------------------------------
def _reference_forward(state, action, params):
    (w1, b1, w2, b2, wq1, bq1, w3, b3, w4, b4, wq2, bq2) = params
    x = jnp.concatenate([state, action], axis=1)
    h1 = jax.nn.relu(x @ w1 + b1)
    h2 = jax.nn.relu(h1 @ w2 + b2)
    q1 = h2 @ wq1 + bq1
    h3 = jax.nn.relu(x @ w3 + b3)
    h4 = jax.nn.relu(h3 @ w4 + b4)
    q2 = h4 @ wq2 + bq2
    return q1, q2


if __name__ == "__main__":
    # Small shapes consistent with the module: batch=8, input_dims=(16,),
    # n_actions=4, fc1_dims=32, fc2_dims=32.
    B, INPUT_DIM, N_ACTIONS, FC1, FC2 = 8, 16, 4, 32, 32

    key = jax.random.PRNGKey(0)
    k_state, k_action, k_params = jax.random.split(key, 3)

    state = jax.random.normal(k_state, (B, INPUT_DIM), jnp.float32)
    action = jax.random.normal(k_action, (B, N_ACTIONS), jnp.float32)

    params = init_params(k_params, INPUT_DIM, N_ACTIONS, FC1, FC2)
    packed = pack_params(params, INPUT_DIM, compute_dtype=jnp.bfloat16)

    q1, q2 = critic_forward(state, action, packed)
    jax.block_until_ready((q1, q2))

    # Sanity-check against a plain-JAX f32 reference of the original module math.
    # Tolerance accounts for bf16 weights/activations on the MXU (f32 accumulate).
    q1_ref, q2_ref = _reference_forward(state, action, params)
    assert q1.shape == (B, 1) and q2.shape == (B, 1)
    assert jnp.allclose(q1, q1_ref, atol=5e-2, rtol=5e-2)
    assert jnp.allclose(q2, q2_ref, atol=5e-2, rtol=5e-2)

    print("KERNEL_OK")
</pallas_src>

<mosaic_0001>
module attributes {stable_mosaic.version = 11 : i64} {
  func.func @_critic_kernel(%arg0: i32, %arg1: memref<8x16xf32, #tpu.memory_space<vmem>>, %arg2: memref<8x4xf32, #tpu.memory_space<vmem>>, %arg3: memref<16x64xbf16, #tpu.memory_space<vmem>>, %arg4: memref<4x64xbf16, #tpu.memory_space<vmem>>, %arg5: memref<1x64xf32, #tpu.memory_space<vmem>>, %arg6: memref<64x64xbf16, #tpu.memory_space<vmem>>, %arg7: memref<1x64xf32, #tpu.memory_space<vmem>>, %arg8: memref<64x2xbf16, #tpu.memory_space<vmem>>, %arg9: memref<1x2xf32, #tpu.memory_space<vmem>>, %arg10: memref<8x2xf32, #tpu.memory_space<vmem>>) attributes {dimension_semantics = [#tpu.dimension_semantics<parallel>], iteration_bounds = array<i64: 1>, scalar_prefetch = 0 : i64, scratch_operands = 0 : i64, tpu.core_type = #tpu.core_type<tc>, window_params = [{transform_indices = @transform_0, window_bounds = array<i64: 8, 16>}, {transform_indices = @transform_1, window_bounds = array<i64: 8, 4>}, {pipeline_mode = #tpu.pipeline_mode<synchronous>, transform_indices = @transform_2, window_bounds = array<i64: 16, 64>}, {pipeline_mode = #tpu.pipeline_mode<synchronous>, transform_indices = @transform_3, window_bounds = array<i64: 4, 64>}, {pipeline_mode = #tpu.pipeline_mode<synchronous>, transform_indices = @transform_4, window_bounds = array<i64: 1, 64>}, {pipeline_mode = #tpu.pipeline_mode<synchronous>, transform_indices = @transform_5, window_bounds = array<i64: 64, 64>}, {pipeline_mode = #tpu.pipeline_mode<synchronous>, transform_indices = @transform_6, window_bounds = array<i64: 1, 64>}, {pipeline_mode = #tpu.pipeline_mode<synchronous>, transform_indices = @transform_7, window_bounds = array<i64: 64, 2>}, {pipeline_mode = #tpu.pipeline_mode<synchronous>, transform_indices = @transform_8, window_bounds = array<i64: 1, 2>}, {transform_indices = @transform_9, window_bounds = array<i64: 8, 2>}]} {
    %c0 = arith.constant 0 : index
    %c0_0 = arith.constant 0 : index
    %0 = vector.load %arg1[%c0, %c0_0] : memref<8x16xf32, #tpu.memory_space<vmem>>, vector<8x16xf32>
    %1 = arith.truncf %0 : vector<8x16xf32> to vector<8x16xbf16>
    %c0_1 = arith.constant 0 : index
    %c0_2 = arith.constant 0 : index
    %2 = vector.load %arg2[%c0_1, %c0_2] : memref<8x4xf32, #tpu.memory_space<vmem>>, vector<8x4xf32>
    %3 = arith.truncf %2 : vector<8x4xf32> to vector<8x4xbf16>
    %c0_3 = arith.constant 0 : index
    %c0_4 = arith.constant 0 : index
    %4 = vector.load %arg3[%c0_3, %c0_4] : memref<16x64xbf16, #tpu.memory_space<vmem>>, vector<16x64xbf16>
    %cst = arith.constant dense<0.000000e+00> : vector<8x64xf32>
    %5 = tpu.matmul %1, %4, %cst {dimension_numbers = #tpu.dot_dimension_numbers<[1], [0], [0], [1], [0, 0, 1, 1], [], []>} : vector<8x16xbf16>, vector<16x64xbf16>, vector<8x64xf32> -> vector<8x64xf32>
    %c0_5 = arith.constant 0 : index
    %c0_6 = arith.constant 0 : index
    %6 = vector.load %arg4[%c0_5, %c0_6] : memref<4x64xbf16, #tpu.memory_space<vmem>>, vector<4x64xbf16>
    %cst_7 = arith.constant dense<0.000000e+00> : vector<8x64xf32>
    %7 = tpu.matmul %3, %6, %cst_7 {dimension_numbers = #tpu.dot_dimension_numbers<[1], [0], [0], [1], [0, 0, 1, 1], [], []>} : vector<8x4xbf16>, vector<4x64xbf16>, vector<8x64xf32> -> vector<8x64xf32>
    %8 = arith.addf %5, %7 : vector<8x64xf32>
    %c0_8 = arith.constant 0 : index
    %c0_9 = arith.constant 0 : index
    %9 = vector.load %arg5[%c0_8, %c0_9] : memref<1x64xf32, #tpu.memory_space<vmem>>, vector<1x64xf32>
    %10 = vector.broadcast %9 : vector<1x64xf32> to vector<8x64xf32>
    %11 = arith.addf %8, %10 : vector<8x64xf32>
    %cst_10 = arith.constant 0.000000e+00 : f32
    %12 = vector.broadcast %cst_10 : f32 to vector<8x64xf32>
    %13 = arith.maximumf %11, %12 : vector<8x64xf32>
    %14 = arith.truncf %13 : vector<8x64xf32> to vector<8x64xbf16>
    %c0_11 = arith.constant 0 : index
    %c0_12 = arith.constant 0 : index
    %15 = vector.load %arg6[%c0_11, %c0_12] : memref<64x64xbf16, #tpu.memory_space<vmem>>, vector<64x64xbf16>
    %cst_13 = arith.constant dense<0.000000e+00> : vector<8x64xf32>
    %16 = tpu.matmul %14, %15, %cst_13 {dimension_numbers = #tpu.dot_dimension_numbers<[1], [0], [0], [1], [0, 0, 1, 1], [], []>} : vector<8x64xbf16>, vector<64x64xbf16>, vector<8x64xf32> -> vector<8x64xf32>
    %c0_14 = arith.constant 0 : index
    %c0_15 = arith.constant 0 : index
    %17 = vector.load %arg7[%c0_14, %c0_15] : memref<1x64xf32, #tpu.memory_space<vmem>>, vector<1x64xf32>
    %18 = vector.broadcast %17 : vector<1x64xf32> to vector<8x64xf32>
    %19 = arith.addf %16, %18 : vector<8x64xf32>
    %cst_16 = arith.constant 0.000000e+00 : f32
    %20 = vector.broadcast %cst_16 : f32 to vector<8x64xf32>
    %21 = arith.maximumf %19, %20 : vector<8x64xf32>
    %22 = arith.truncf %21 : vector<8x64xf32> to vector<8x64xbf16>
    %c0_17 = arith.constant 0 : index
    %c0_18 = arith.constant 0 : index
    %23 = vector.load %arg8[%c0_17, %c0_18] : memref<64x2xbf16, #tpu.memory_space<vmem>>, vector<64x2xbf16>
    %cst_19 = arith.constant dense<0.000000e+00> : vector<8x2xf32>
    %24 = tpu.matmul %22, %23, %cst_19 {dimension_numbers = #tpu.dot_dimension_numbers<[1], [0], [0], [1], [0, 0, 1, 1], [], []>} : vector<8x64xbf16>, vector<64x2xbf16>, vector<8x2xf32> -> vector<8x2xf32>
    %c0_20 = arith.constant 0 : index
    %c0_21 = arith.constant 0 : index
    %25 = vector.load %arg9[%c0_20, %c0_21] : memref<1x2xf32, #tpu.memory_space<vmem>>, vector<1x2xf32>
    %26 = vector.broadcast %25 : vector<1x2xf32> to vector<8x2xf32>
    %27 = arith.addf %24, %26 : vector<8x2xf32>
    %c0_22 = arith.constant 0 : index
    %c0_23 = arith.constant 0 : index
    %28 = vector.load %arg10[%c0_22, %c0_23] : memref<8x2xf32, #tpu.memory_space<vmem>>, vector<8x2xf32>
    tpu.vector_store %arg10[%c0_22, %c0_23], %27 {strides = array<i32>} : memref<8x2xf32, #tpu.memory_space<vmem>>, vector<8x2xf32>,
    return
  }
  func.func @transform_0(%arg0: i32) -> (i32, i32) {
    %c0_i32 = arith.constant 0 : i32
    %c0_i32_0 = arith.constant 0 : i32
    return %arg0, %c0_i32 : i32, i32
  }
  func.func @transform_1(%arg0: i32) -> (i32, i32) {
    %c0_i32 = arith.constant 0 : i32
    %c0_i32_0 = arith.constant 0 : i32
    return %arg0, %c0_i32 : i32, i32
  }
  func.func @transform_2(%arg0: i32) -> (i32, i32) {
    %c0_i32 = arith.constant 0 : i32
    %c0_i32_0 = arith.constant 0 : i32
    %c0_i32_1 = arith.constant 0 : i32
    return %c0_i32, %c0_i32_0 : i32, i32
  }
  func.func @transform_3(%arg0: i32) -> (i32, i32) {
    %c0_i32 = arith.constant 0 : i32
    %c0_i32_0 = arith.constant 0 : i32
    %c0_i32_1 = arith.constant 0 : i32
    return %c0_i32, %c0_i32_0 : i32, i32
  }
  func.func @transform_4(%arg0: i32) -> (i32, i32) {
    %c0_i32 = arith.constant 0 : i32
    %c0_i32_0 = arith.constant 0 : i32
    %c0_i32_1 = arith.constant 0 : i32
    return %c0_i32, %c0_i32_0 : i32, i32
  }
  func.func @transform_5(%arg0: i32) -> (i32, i32) {
    %c0_i32 = arith.constant 0 : i32
    %c0_i32_0 = arith.constant 0 : i32
    %c0_i32_1 = arith.constant 0 : i32
    return %c0_i32, %c0_i32_0 : i32, i32
  }
  func.func @transform_6(%arg0: i32) -> (i32, i32) {
    %c0_i32 = arith.constant 0 : i32
    %c0_i32_0 = arith.constant 0 : i32
    %c0_i32_1 = arith.constant 0 : i32
    return %c0_i32, %c0_i32_0 : i32, i32
  }
  func.func @transform_7(%arg0: i32) -> (i32, i32) {
    %c0_i32 = arith.constant 0 : i32
    %c0_i32_0 = arith.constant 0 : i32
    %c0_i32_1 = arith.constant 0 : i32
    return %c0_i32, %c0_i32_0 : i32, i32
  }
  func.func @transform_8(%arg0: i32) -> (i32, i32) {
    %c0_i32 = arith.constant 0 : i32
    %c0_i32_0 = arith.constant 0 : i32
    %c0_i32_1 = arith.constant 0 : i32
    return %c0_i32, %c0_i32_0 : i32, i32
  }
  func.func @transform_9(%arg0: i32) -> (i32, i32) {
    %c0_i32 = arith.constant 0 : i32
    %c0_i32_0 = arith.constant 0 : i32
    return %arg0, %c0_i32 : i32, i32
  }
}

</mosaic_0001>

<bundles_post_ra>
// kernel: tpu_custom_call.1
= control target key start
LH: loop header
LB: loop body
LE: loop exit
PB: predicated region body
PF: predicated region fallthrough
CT: control target
= control target key end

     0   :  { %vm44_vm0 = vcmask 1041408   ;;  %v398_v0 = vmov 0.0   ;;  %vm399_vm1 = vmmov 0   ;;  %vm40_vm2 = vcmask 31744   ;;  %s504_s3 = inlined_call_operand.vmem [shape: bf16[4,64], index: 3, kind: input, shape index: {}]   ;;  %s505_s2 = inlined_call_operand.vmem [shape: bf16[16,64], index: 2, kind: input, shape index: {}]   ;;  %s506_s1 = inlined_call_operand.vmem [shape: f32[8,4], index: 1, kind: input, shape index: {}]   ;;  %s507_s0 = inlined_call_operand.vmem [shape: f32[8,16], index: 0, kind: input, shape index: {}]   ;;  %s508_s5 = inlined_call_operand.vmem [shape: bf16[64,64], index: 5, kind: input, shape index: {}]   ;;  %s509_s7 = inlined_call_operand.vmem [shape: bf16[64,2], index: 7, kind: input, shape index: {}]   ;;  %s510_s4 = inlined_call_operand.vmem [shape: f32[1,64], index: 4, kind: input, shape index: {}]   ;;  %s511_s6 = inlined_call_operand.vmem [shape: f32[1,64], index: 6, kind: input, shape index: {}]   ;;  %s512_s8 = inlined_call_operand.vmem [shape: f32[1,2], index: 8, kind: input, shape index: {}]   ;;  %s513_s9 = inlined_call_operand.vmem [shape: f32[8,2], index: 9, kind: output, shape index: {}]  }
   0x1   :  { %351 = vmatprep.subr.bf16.mxu0 %v398_v0  ;;  %v39_v1 = vld [vmem:[%s504_s3] sm:$0x3]  ;;  %357 = vmatprep.subr.bf16.mxu1 %v398_v0  ;;  %v390_v8 = vld [vmem:[%s508_s5 + $0x18] sm:$0xff]   ;;  %vm94_vm3 = vcmask 130048   ;;  %v391_v9 = vld [vmem:[%s508_s5 + $0x10] sm:$0xff]   ;;  %vm187_vm4 = vcmask 523264  }
   0x2   :  { %v46_v2 = vsel %vm44_vm0, %v39_v1, 0  ;;  %v389_v3 = vld [vmem:[%s505_s2] sm:$0xff]   ;;  %353 = vmatprep.mubr.msk.bf16.mxu0 %vm399_vm1, %v398_v0  ;;  %359 = vmatprep.mubr.msk.bf16.mxu1 %vm399_vm1, %v398_v0  ;;  %v392_v10 = vld [vmem:[%s508_s5 + $0x8] sm:$0xff]   ;;  %v394_v12 = vld [vmem:[%s509_s7 + $0x18] sm:$0xff]   ;;  %vm315_vm5 = vcmask 15360  }
   0x3   :  { %v35_v4 = vld [vmem:[%s506_s1] sm:$0xff]  ;;  %352 = vmatpush3.bf16.msra.mxu0 %v46_v2  ;;  %358 = vmatpush3.bf16.msra.mxu1 %v389_v3  ;;  %v395_v13 = vld [vmem:[%s509_s7 + $0x10] sm:$0xff]   ;;  %v396_v27 = vld [vmem:[%s509_s7 + $0x8] sm:$0xff]  }
   0x4   :  { %v33_v5 = vld [vmem:[%s507_s0] sm:$0xff]  ;;  %v36_v6 = vpack.c.bf16 %v35_v4, %v35_v4  ;;  %363 = vmatprep.subr.bf16.mxu0 %v398_v0  ;;  %375 = vmatprep.subr.bf16.mxu1 %v398_v0 }
   0x5   :  { %v34_v7 = vpack.c.bf16 %v33_v5, %v33_v5  ;;  %v393_v11 = vld [vmem:[%s508_s5] sm:$0xff]  }
   0x6   :  { %354 = vmatmul.mubr.msk.bf16.vlgmr.msra.gmra.mxu0 %vm40_vm2, %v36_v6  ;;  %v324_v16 = vld [vmem:[%s510_s4] ss:$0 sm:$0xff] }
   0x7   :  { %360 = vmatmul.mubr.msk.bf16.vlgmr.msra.gmra.mxu1 %vm94_vm3, %v34_v7  ;;  %364 = vmatpush3.bf16.msra.mxu0 %v390_v8  ;;  %v397_v28 = vld [vmem:[%s509_s7] sm:$0xff]  }
   0x8   :  { %365 = vmatprep.subr.bf16.mxu0 %v398_v0  ;;  %371 = vmatprep.mubr.msk.bf16.mxu0 %vm399_vm1, %v398_v0  ;;  %v325_v29 = vld [vmem:[%s511_s6] ss:$0 sm:$0xff] }
   0x9   :  { %383 = vmatprep.mubr.msk.bf16.mxu1 %vm399_vm1, %v398_v0  ;;  %376 = vmatpush3.bf16.msra.mxu1 %v394_v12  ;;  %v331_v37 = vld [vmem:[%s512_s8] ss:$0 sm:$0xff] }
   0xa   :  { %377 = vmatprep.subr.bf16.mxu1 %v398_v0 }
   0xb   :  { %366 = vmatpush3.bf16.msra.mxu0 %v391_v9 }
   0xc   :  { %367 = vmatprep.subr.bf16.mxu0 %v398_v0 }
   0xd   :  { %378 = vmatpush3.bf16.msra.mxu1 %v395_v13 }
   0xe   :  { %379 = vmatprep.subr.bf16.mxu1 %v398_v0 }
   0xf   :  { %368 = vmatpush3.bf16.msra.mxu0 %v392_v10 }
  0x10   :  { %369 = vmatprep.subr.bf16.mxu0 %v398_v0 }
  0x11   :  { %380 = vmatpush3.bf16.msra.mxu1 %v396_v27 }
  0x12   :  { %381 = vmatprep.subr.bf16.mxu1 %v398_v0 }
  0x13   :  { %370 = vmatpush3.bf16.msra.mxu0 %v393_v11 }
  0x15   :  { %382 = vmatpush3.bf16.msra.mxu1 %v397_v28 }
  0xc6   :  { %v82_v14 = vpop.f32.mrf.mxu0 }
  0xc7   :  { %v132_v15 = vpop.f32.mrf.mxu1 }
  0xc8   :  { %v133_v17 = vadd.f32 %v132_v15, %v82_v14  ;;  %v355_v18 = vpop.f32.mrf.mxu0 }
  0xc9   :  { %v361_v19 = vpop.f32.mrf.mxu1 }
  0xca   :  { %v145_v20 = vadd.f32 %v324_v16, %v133_v17  ;;  %v85_v21 = vpop.f32.mrf.mxu0 }
  0xcb   :  { %v135_v22 = vpop.f32.mrf.mxu1 }
  0xcc   :  { %v146_v23 = vmax.f32 %v145_v20, 0.0  ;;  %v356_v24 = vpop.f32.mrf.mxu0 }
  0xcd   :  { %v362_v25 = vpop.f32.mrf.mxu1 }
  0xce   :  { %v147_v26 = vpack.c.bf16 %v146_v23, %v146_v23 }
  0xd0   :  { %372 = vmatmul.mubr.msk.bf16.vlgmr.msra.gmra.mxu0 %vm187_vm4, %v147_v26 }
 0x190   :  { %v225_v30 = vpop.f32.mrf.mxu0 }
 0x191   :  { %v226_v31 = vadd.f32 %v325_v29, %v225_v30 }
 0x192   :  { %v373_v32 = vpop.f32.mrf.mxu0 }
 0x193   :  { %v231_v33 = vmax.f32 %v226_v31, 0.0 }
 0x194   :  { %v228_v34 = vpop.f32.mrf.mxu0 }
 0x195   :  { %v232_v35 = vpack.c.bf16 %v231_v33, %v231_v33 }
 0x196   :  { %v374_v36 = vpop.f32.mrf.mxu0 }
 0x197   :  { %384 = vmatmul.mubr.msk.bf16.vlgmr.msra.gmra.mxu1 %vm187_vm4, %v232_v35 }
 0x257   :  { %v309_v38 = vpop.f32.mrf.mxu1 }
 0x258   :  { %v310_v39 = vadd.f32 %v331_v37, %v309_v38 }
 0x259   :  { %v385_v40 = vpop.f32.mrf.mxu1 }
 0x25a   :  { %316 = vst.msk [vmem:[%s513_s9] sm:$0xff] %vm315_vm5, %v310_v39 }
 0x25b   :  { %v312_v41 = vpop.f32.mrf.mxu1 }
 0x25d   :  { %v386_v42 = vpop.f32.mrf.mxu1 }

</bundles_post_ra>
